<compile_context>
chip_gen: v7x
topology: tpu7x:2x2x1
jax: 0.10.0
libtpu: 0.0.40
codegen_flags: <defaults>
</compile_context>

<pallas_src>
import functools

import numpy as np

import jax
import jax.numpy as jnp
from jax.experimental import pallas as pl
from jax.experimental.pallas import tpu as pltpu

LANES = 128


def _round_up(x, m):
    return (x + m - 1) // m * m


# ---------------------------------------------------------------------------
# Kernel
# ---------------------------------------------------------------------------
def _fc_block_kernel(outermost_linear, matmul_dtype, x_ref, *refs):
    """Fused MLP over one lane-dense row tile.

    x_ref  : [tm, 128]  -- tm stored rows, each holding (128 // (G*c)) groups of
                           G coords x c padded input features.
    refs   : (w0, b0, w1, b1, ..., w_{L-1}, b_{L-1}, out_ref)
             w_l are bf16 block-diagonal packed weights, b_l are f32 [1, width].
    out_ref: [tm, 128]  -- same row packing, c padded output features per coord.
    """
    out_ref = refs[-1]
    params = refs[:-1]
    num_layers = len(params) // 2

    x = x_ref[...]                              # [tm, 128]
    tm = x.shape[0]
    gw_in = params[0].shape[0]                  # G * c  (packed width of layer-0 input)
    s = x.shape[1] // gw_in                     # computation rows folded per stored row

    # Unpack: split the 128 dense lanes into s groups of gw_in lanes and stack
    # them along rows -> [s*tm, gw_in].  Static lane slices + row concat only.
    if s > 1:
        h = jnp.concatenate(
            [x[:, j * gw_in:(j + 1) * gw_in] for j in range(s)], axis=0)
    else:
        h = x
    h = h.astype(jnp.float32)

    for layer in range(num_layers):
        w = params[2 * layer][...]              # bf16 block-diagonal weight
        b = params[2 * layer + 1][...]          # f32 bias row
        h = jnp.dot(h.astype(matmul_dtype), w,
                    preferred_element_type=jnp.float32) + b
        if not (layer == num_layers - 1 and outermost_linear):
            h = jnp.maximum(h, 0.0)             # ReLU (f32)

    # Repack: s groups of gw_out lanes back into lane-dense 128-wide rows.
    if s > 1:
        h = jnp.concatenate(
            [h[j * tm:(j + 1) * tm, :] for j in range(s)], axis=1)
    out_ref[...] = h.astype(out_ref.dtype)


# ---------------------------------------------------------------------------
# One-time parameter packing (hoisted off the launch path; pure numpy)
# ---------------------------------------------------------------------------
def _block_diag_np(w, g):
    d_in, d_out = w.shape
    out = np.zeros((g * d_in, g * d_out), np.float32)
    for i in range(g):
        out[i * d_in:(i + 1) * d_in, i * d_out:(i + 1) * d_out] = w
    return out


def pack_fc_block_params(weights, biases, *, matmul_dtype=jnp.bfloat16):
    """Pack FCBlock parameters once for the fused kernel.

    weights: list of [d_in, d_out] arrays (transposed from PyTorch [out, in]).
    biases : list of [d_out] arrays.

    Returns (packed_params, meta).  packed_params is the interleaved list
    [w0, b0, w1, b1, ...] with block-diagonal bf16 weights and tiled f32 biases.
    """
    weights = [np.asarray(w, np.float32) for w in weights]
    biases = [np.asarray(b, np.float32) for b in biases]
    num_layers = len(weights)
    in_f = weights[0].shape[0]
    out_f = weights[-1].shape[1]
    hidden = [w.shape[1] for w in weights[:-1]] or [1]

    if max(in_f, out_f) > LANES:
        # TODO(synk): fall back to an unpacked, plainly tiled path for in/out
        # feature widths > 128 (not the coordinate-MLP regime FCBlock targets).
        raise NotImplementedError("packed path assumes in/out features <= 128")

    # c      : padded lanes per coord for input AND output (power of 2).
    # rtot   : coords packed into each 128-lane stored row.
    # group  : coords processed per computation row (block-diagonal factor G).
    c = pl.next_power_of_2(max(in_f, out_f))
    rtot = LANES // c
    group = max(1, LANES // pl.next_power_of_2(max(hidden)))
    group = min(group, rtot)
    h_pad = max(max(hidden), LANES // group)    # padded hidden width per coord

    d_ins = [c] + [h_pad] * (num_layers - 1)
    d_outs = [h_pad] * (num_layers - 1) + [c]

    packed = []
    for w, b, di, do in zip(weights, biases, d_ins, d_outs):
        wp = np.zeros((di, do), np.float32)
        wp[:w.shape[0], :w.shape[1]] = w
        bp = np.zeros((do,), np.float32)
        bp[:b.shape[0]] = b
        packed.append(jnp.asarray(_block_diag_np(wp, group), dtype=matmul_dtype))
        packed.append(jnp.asarray(np.tile(bp, group).reshape(1, -1),
                                  dtype=jnp.float32))

    meta = dict(in_f=in_f, out_f=out_f, c=c, rtot=rtot, group=group,
                num_layers=num_layers)
    return packed, meta


# ---------------------------------------------------------------------------
# Forward wrapper
# ---------------------------------------------------------------------------
def fc_block_forward(coords, packed_params, meta, *, outermost_linear=False,
                     matmul_dtype=jnp.bfloat16, block_rows=512):
    """Run the FCBlock MLP with a single fused Pallas kernel.

    coords       : [..., in_features] float32.
    packed_params: output of pack_fc_block_params (call once, reuse per forward).
    block_rows   : stored rows per grid step (coords per step = block_rows * rtot).
    """
    in_f, out_f = meta['in_f'], meta['out_f']
    c, rtot = meta['c'], meta['rtot']
    f32 = jnp.float32

    lead = coords.shape[:-1]
    coords2 = coords.reshape(-1, coords.shape[-1])
    N = coords2.shape[0]

    rows = pl.cdiv(N, rtot)                     # stored rows needed
    # Large tile to amortize per-step overhead, but keep >= 2 grid steps so the
    # "parallel" row axis can shard across v7x's two TensorCores.
    tm = max(8, min(block_rows, _round_up(pl.cdiv(rows, 2), 8)))
    rows_pad = _round_up(rows, tm)

    # Lane-dense input packing: [N, in_f] -> [rows_pad, 128]
    # (rtot consecutive coords x c zero-padded features per stored row).
    x = jnp.pad(coords2.astype(f32),
                ((0, rows_pad * rtot - N), (0, c - in_f)))
    x = x.reshape(rows_pad, rtot * c)

    in_specs = [pl.BlockSpec((tm, LANES), lambda i: (i, 0))]
    for p in packed_params:
        in_specs.append(pl.BlockSpec(p.shape, lambda i: (0, 0)))  # resident params

    comp_rows = rows_pad * (rtot // meta['group'])
    flops = 2 * comp_rows * sum(
        int(packed_params[2 * l].shape[0]) * int(packed_params[2 * l].shape[1])
        for l in range(meta['num_layers']))
    bytes_accessed = (int(x.size) * 4 + rows_pad * LANES * 4
                      + sum(int(p.size) * p.dtype.itemsize for p in packed_params))

    kernel = functools.partial(_fc_block_kernel, outermost_linear, matmul_dtype)

    packed_out = pl.pallas_call(
        kernel,
        out_shape=jax.ShapeDtypeStruct((rows_pad, LANES), f32),
        grid_spec=pltpu.PrefetchScalarGridSpec(
            num_scalar_prefetch=0,
            grid=(rows_pad // tm,),
            in_specs=in_specs,
            out_specs=pl.BlockSpec((tm, LANES), lambda i: (i, 0)),
        ),
        compiler_params=pltpu.CompilerParams(
            dimension_semantics=("parallel",)),
        cost_estimate=pl.CostEstimate(flops=flops, transcendentals=0,
                                      bytes_accessed=bytes_accessed),
    )(x, *packed_params)

    # Unpack: [rows_pad, 128] -> [rows_pad*rtot, c] -> [N, out_f]
    out = packed_out.reshape(rows_pad * rtot, c)[:N, :out_f]
    return out.reshape(*lead, out_f).astype(coords.dtype)


# ---------------------------------------------------------------------------
# Synthetic parameters + reference
# ---------------------------------------------------------------------------
def make_fc_block_params(key, in_features, out_features, num_hidden_layers,
                         hidden_features):
    """Synthetic parameters with the same shapes as FCBlock (relu config):
    Linear(in, h) ; num_hidden_layers x Linear(h, h) ; Linear(h, out)."""
    dims = ([in_features] + [hidden_features] * (num_hidden_layers + 1)
            + [out_features])
    weights, biases = [], []
    for i in range(len(dims) - 1):
        d_in, d_out = dims[i], dims[i + 1]
        key, kw, kb = jax.random.split(key, 3)
        std = (2.0 / d_in) ** 0.5   # kaiming-style synthetic init (not a checkpoint)
        weights.append(std * jax.random.normal(kw, (d_in, d_out), jnp.float32))
        biases.append(0.01 * jax.random.normal(kb, (d_out,), jnp.float32))
    return weights, biases


def _reference_forward(coords, weights, biases, outermost_linear=False):
    h = coords
    for i, (w, b) in enumerate(zip(weights, biases)):
        h = h @ w + b
        if not (i == len(weights) - 1 and outermost_linear):
            h = jnp.maximum(h, 0.0)
    return h


if __name__ == "__main__":
    # Small shapes consistent with FCBlock usage (coords -> features).
    in_features = 3
    out_features = 4
    hidden_features = 32
    num_hidden_layers = 2
    N = 256                      # number of coordinate points (rows)

    key = jax.random.PRNGKey(0)
    key, kx = jax.random.split(key)
    coords = jax.random.uniform(kx, (N, in_features), jnp.float32,
                                minval=-1.0, maxval=1.0)

    weights, biases = make_fc_block_params(
        key, in_features, out_features, num_hidden_layers, hidden_features)

    # One-time parameter packing (hoisted off the per-forward launch path).
    packed_params, meta = pack_fc_block_params(weights, biases)

    out = fc_block_forward(coords, packed_params, meta, outermost_linear=False)
    out = jax.block_until_ready(out)

    ref = _reference_forward(coords, weights, biases, outermost_linear=False)
    assert out.shape == (N, out_features)
    # bf16 matmul operands (f32 accumulation) => ~1e-2-level relative drift.
    assert jnp.allclose(out, ref, atol=5e-2, rtol=5e-2), \
        float(jnp.max(jnp.abs(out - ref)))

    print("KERNEL_OK")
</pallas_src>

<mosaic_0001>
module attributes {stable_mosaic.version = 11 : i64} {
  func.func @_fc_block_kernel(%arg0: i32, %arg1: memref<8x128xf32, #tpu.memory_space<vmem>>, %arg2: memref<16x128xbf16, #tpu.memory_space<vmem>>, %arg3: memref<1x128xf32, #tpu.memory_space<vmem>>, %arg4: memref<128x128xbf16, #tpu.memory_space<vmem>>, %arg5: memref<1x128xf32, #tpu.memory_space<vmem>>, %arg6: memref<128x128xbf16, #tpu.memory_space<vmem>>, %arg7: memref<1x128xf32, #tpu.memory_space<vmem>>, %arg8: memref<128x16xbf16, #tpu.memory_space<vmem>>, %arg9: memref<1x16xf32, #tpu.memory_space<vmem>>, %arg10: memref<8x128xf32, #tpu.memory_space<vmem>>) attributes {dimension_semantics = [#tpu.dimension_semantics<parallel>], iteration_bounds = array<i64: 1>, scalar_prefetch = 0 : i64, scratch_operands = 0 : i64, tpu.core_type = #tpu.core_type<tc>, window_params = [{transform_indices = @transform_0, window_bounds = array<i64: 8, 128>}, {pipeline_mode = #tpu.pipeline_mode<synchronous>, transform_indices = @transform_1, window_bounds = array<i64: 16, 128>}, {pipeline_mode = #tpu.pipeline_mode<synchronous>, transform_indices = @transform_2, window_bounds = array<i64: 1, 128>}, {pipeline_mode = #tpu.pipeline_mode<synchronous>, transform_indices = @transform_3, window_bounds = array<i64: 128, 128>}, {pipeline_mode = #tpu.pipeline_mode<synchronous>, transform_indices = @transform_4, window_bounds = array<i64: 1, 128>}, {pipeline_mode = #tpu.pipeline_mode<synchronous>, transform_indices = @transform_5, window_bounds = array<i64: 128, 128>}, {pipeline_mode = #tpu.pipeline_mode<synchronous>, transform_indices = @transform_6, window_bounds = array<i64: 1, 128>}, {pipeline_mode = #tpu.pipeline_mode<synchronous>, transform_indices = @transform_7, window_bounds = array<i64: 128, 16>}, {pipeline_mode = #tpu.pipeline_mode<synchronous>, transform_indices = @transform_8, window_bounds = array<i64: 1, 16>}, {transform_indices = @transform_9, window_bounds = array<i64: 8, 128>}]} {
    %c0 = arith.constant 0 : index
    %c0_0 = arith.constant 0 : index
    %0 = vector.load %arg1[%c0, %c0_0] : memref<8x128xf32, #tpu.memory_space<vmem>>, vector<8x128xf32>
    %1 = vector.extract_strided_slice %0 {offsets = [0, 0], sizes = [8, 16], strides = [1, 1]} : vector<8x128xf32> to vector<8x16xf32>
    %2 = vector.extract_strided_slice %0 {offsets = [0, 16], sizes = [8, 16], strides = [1, 1]} : vector<8x128xf32> to vector<8x16xf32>
    %3 = vector.extract_strided_slice %0 {offsets = [0, 32], sizes = [8, 16], strides = [1, 1]} : vector<8x128xf32> to vector<8x16xf32>
    %4 = vector.extract_strided_slice %0 {offsets = [0, 48], sizes = [8, 16], strides = [1, 1]} : vector<8x128xf32> to vector<8x16xf32>
    %5 = vector.extract_strided_slice %0 {offsets = [0, 64], sizes = [8, 16], strides = [1, 1]} : vector<8x128xf32> to vector<8x16xf32>
    %6 = vector.extract_strided_slice %0 {offsets = [0, 80], sizes = [8, 16], strides = [1, 1]} : vector<8x128xf32> to vector<8x16xf32>
    %7 = vector.extract_strided_slice %0 {offsets = [0, 96], sizes = [8, 16], strides = [1, 1]} : vector<8x128xf32> to vector<8x16xf32>
    %8 = vector.extract_strided_slice %0 {offsets = [0, 112], sizes = [8, 16], strides = [1, 1]} : vector<8x128xf32> to vector<8x16xf32>
    %9 = tpu.concatenate %1, %2, %3, %4, %5, %6, %7, %8 in 0 : vector<8x16xf32>, vector<8x16xf32>, vector<8x16xf32>, vector<8x16xf32>, vector<8x16xf32>, vector<8x16xf32>, vector<8x16xf32>, vector<8x16xf32> -> vector<64x16xf32>
    %c0_1 = arith.constant 0 : index
    %c0_2 = arith.constant 0 : index
    %10 = vector.load %arg2[%c0_1, %c0_2] : memref<16x128xbf16, #tpu.memory_space<vmem>>, vector<16x128xbf16>
    %c0_3 = arith.constant 0 : index
    %c0_4 = arith.constant 0 : index
    %11 = vector.load %arg3[%c0_3, %c0_4] : memref<1x128xf32, #tpu.memory_space<vmem>>, vector<1x128xf32>
    %12 = arith.truncf %9 : vector<64x16xf32> to vector<64x16xbf16>
    %cst = arith.constant dense<0.000000e+00> : vector<64x128xf32>
    %13 = tpu.matmul %12, %10, %cst {dimension_numbers = #tpu.dot_dimension_numbers<[1], [0], [0], [1], [0, 0, 1, 1], [], []>} : vector<64x16xbf16>, vector<16x128xbf16>, vector<64x128xf32> -> vector<64x128xf32>
    %14 = vector.broadcast %11 : vector<1x128xf32> to vector<64x128xf32>
    %15 = arith.addf %13, %14 : vector<64x128xf32>
    %cst_5 = arith.constant 0.000000e+00 : f32
    %16 = vector.broadcast %cst_5 : f32 to vector<64x128xf32>
    %17 = arith.maximumf %15, %16 : vector<64x128xf32>
    %c0_6 = arith.constant 0 : index
    %c0_7 = arith.constant 0 : index
    %18 = vector.load %arg4[%c0_6, %c0_7] : memref<128x128xbf16, #tpu.memory_space<vmem>>, vector<128x128xbf16>
    %c0_8 = arith.constant 0 : index
    %c0_9 = arith.constant 0 : index
    %19 = vector.load %arg5[%c0_8, %c0_9] : memref<1x128xf32, #tpu.memory_space<vmem>>, vector<1x128xf32>
    %20 = arith.truncf %17 : vector<64x128xf32> to vector<64x128xbf16>
    %cst_10 = arith.constant dense<0.000000e+00> : vector<64x128xf32>
    %21 = tpu.matmul %20, %18, %cst_10 {dimension_numbers = #tpu.dot_dimension_numbers<[1], [0], [0], [1], [0, 0, 1, 1], [], []>} : vector<64x128xbf16>, vector<128x128xbf16>, vector<64x128xf32> -> vector<64x128xf32>
    %22 = vector.broadcast %19 : vector<1x128xf32> to vector<64x128xf32>
    %23 = arith.addf %21, %22 : vector<64x128xf32>
    %cst_11 = arith.constant 0.000000e+00 : f32
    %24 = vector.broadcast %cst_11 : f32 to vector<64x128xf32>
    %25 = arith.maximumf %23, %24 : vector<64x128xf32>
    %c0_12 = arith.constant 0 : index
    %c0_13 = arith.constant 0 : index
    %26 = vector.load %arg6[%c0_12, %c0_13] : memref<128x128xbf16, #tpu.memory_space<vmem>>, vector<128x128xbf16>
    %c0_14 = arith.constant 0 : index
    %c0_15 = arith.constant 0 : index
    %27 = vector.load %arg7[%c0_14, %c0_15] : memref<1x128xf32, #tpu.memory_space<vmem>>, vector<1x128xf32>
    %28 = arith.truncf %25 : vector<64x128xf32> to vector<64x128xbf16>
    %cst_16 = arith.constant dense<0.000000e+00> : vector<64x128xf32>
    %29 = tpu.matmul %28, %26, %cst_16 {dimension_numbers = #tpu.dot_dimension_numbers<[1], [0], [0], [1], [0, 0, 1, 1], [], []>} : vector<64x128xbf16>, vector<128x128xbf16>, vector<64x128xf32> -> vector<64x128xf32>
    %30 = vector.broadcast %27 : vector<1x128xf32> to vector<64x128xf32>
    %31 = arith.addf %29, %30 : vector<64x128xf32>
    %cst_17 = arith.constant 0.000000e+00 : f32
    %32 = vector.broadcast %cst_17 : f32 to vector<64x128xf32>
    %33 = arith.maximumf %31, %32 : vector<64x128xf32>
    %c0_18 = arith.constant 0 : index
    %c0_19 = arith.constant 0 : index
    %34 = vector.load %arg8[%c0_18, %c0_19] : memref<128x16xbf16, #tpu.memory_space<vmem>>, vector<128x16xbf16>
    %c0_20 = arith.constant 0 : index
    %c0_21 = arith.constant 0 : index
    %35 = vector.load %arg9[%c0_20, %c0_21] : memref<1x16xf32, #tpu.memory_space<vmem>>, vector<1x16xf32>
    %36 = arith.truncf %33 : vector<64x128xf32> to vector<64x128xbf16>
    %cst_22 = arith.constant dense<0.000000e+00> : vector<64x16xf32>
    %37 = tpu.matmul %36, %34, %cst_22 {dimension_numbers = #tpu.dot_dimension_numbers<[1], [0], [0], [1], [0, 0, 1, 1], [], []>} : vector<64x128xbf16>, vector<128x16xbf16>, vector<64x16xf32> -> vector<64x16xf32>
    %38 = vector.broadcast %35 : vector<1x16xf32> to vector<64x16xf32>
    %39 = arith.addf %37, %38 : vector<64x16xf32>
    %cst_23 = arith.constant 0.000000e+00 : f32
    %40 = vector.broadcast %cst_23 : f32 to vector<64x16xf32>
    %41 = arith.maximumf %39, %40 : vector<64x16xf32>
    %42 = vector.extract_strided_slice %41 {offsets = [0, 0], sizes = [8, 16], strides = [1, 1]} : vector<64x16xf32> to vector<8x16xf32>
    %43 = vector.extract_strided_slice %41 {offsets = [8, 0], sizes = [8, 16], strides = [1, 1]} : vector<64x16xf32> to vector<8x16xf32>
    %44 = vector.extract_strided_slice %41 {offsets = [16, 0], sizes = [8, 16], strides = [1, 1]} : vector<64x16xf32> to vector<8x16xf32>
    %45 = vector.extract_strided_slice %41 {offsets = [24, 0], sizes = [8, 16], strides = [1, 1]} : vector<64x16xf32> to vector<8x16xf32>
    %46 = vector.extract_strided_slice %41 {offsets = [32, 0], sizes = [8, 16], strides = [1, 1]} : vector<64x16xf32> to vector<8x16xf32>
    %47 = vector.extract_strided_slice %41 {offsets = [40, 0], sizes = [8, 16], strides = [1, 1]} : vector<64x16xf32> to vector<8x16xf32>
    %48 = vector.extract_strided_slice %41 {offsets = [48, 0], sizes = [8, 16], strides = [1, 1]} : vector<64x16xf32> to vector<8x16xf32>
    %49 = vector.extract_strided_slice %41 {offsets = [56, 0], sizes = [8, 16], strides = [1, 1]} : vector<64x16xf32> to vector<8x16xf32>
    %50 = tpu.concatenate %42, %43, %44, %45, %46, %47, %48, %49 in 1 : vector<8x16xf32>, vector<8x16xf32>, vector<8x16xf32>, vector<8x16xf32>, vector<8x16xf32>, vector<8x16xf32>, vector<8x16xf32>, vector<8x16xf32> -> vector<8x128xf32>
    %c0_24 = arith.constant 0 : index
    %c0_25 = arith.constant 0 : index
    %51 = vector.load %arg10[%c0_24, %c0_25] : memref<8x128xf32, #tpu.memory_space<vmem>>, vector<8x128xf32>
    tpu.vector_store %arg10[%c0_24, %c0_25], %50 {strides = array<i32>} : memref<8x128xf32, #tpu.memory_space<vmem>>, vector<8x128xf32>,
    return
  }
  func.func @transform_0(%arg0: i32) -> (i32, i32) {
    %c0_i32 = arith.constant 0 : i32
    %c0_i32_0 = arith.constant 0 : i32
    return %arg0, %c0_i32 : i32, i32
  }
  func.func @transform_1(%arg0: i32) -> (i32, i32) {
    %c0_i32 = arith.constant 0 : i32
    %c0_i32_0 = arith.constant 0 : i32
    %c0_i32_1 = arith.constant 0 : i32
    return %c0_i32, %c0_i32_0 : i32, i32
  }
  func.func @transform_2(%arg0: i32) -> (i32, i32) {
    %c0_i32 = arith.constant 0 : i32
    %c0_i32_0 = arith.constant 0 : i32
    %c0_i32_1 = arith.constant 0 : i32
    return %c0_i32, %c0_i32_0 : i32, i32
  }
  func.func @transform_3(%arg0: i32) -> (i32, i32) {
    %c0_i32 = arith.constant 0 : i32
    %c0_i32_0 = arith.constant 0 : i32
    %c0_i32_1 = arith.constant 0 : i32
    return %c0_i32, %c0_i32_0 : i32, i32
  }
  func.func @transform_4(%arg0: i32) -> (i32, i32) {
    %c0_i32 = arith.constant 0 : i32
    %c0_i32_0 = arith.constant 0 : i32
    %c0_i32_1 = arith.constant 0 : i32
    return %c0_i32, %c0_i32_0 : i32, i32
  }
  func.func @transform_5(%arg0: i32) -> (i32, i32) {
    %c0_i32 = arith.constant 0 : i32
    %c0_i32_0 = arith.constant 0 : i32
    %c0_i32_1 = arith.constant 0 : i32
    return %c0_i32, %c0_i32_0 : i32, i32
  }
  func.func @transform_6(%arg0: i32) -> (i32, i32) {
    %c0_i32 = arith.constant 0 : i32
    %c0_i32_0 = arith.constant 0 : i32
    %c0_i32_1 = arith.constant 0 : i32
    return %c0_i32, %c0_i32_0 : i32, i32
  }
  func.func @transform_7(%arg0: i32) -> (i32, i32) {
    %c0_i32 = arith.constant 0 : i32
    %c0_i32_0 = arith.constant 0 : i32
    %c0_i32_1 = arith.constant 0 : i32
    return %c0_i32, %c0_i32_0 : i32, i32
  }
  func.func @transform_8(%arg0: i32) -> (i32, i32) {
    %c0_i32 = arith.constant 0 : i32
    %c0_i32_0 = arith.constant 0 : i32
    %c0_i32_1 = arith.constant 0 : i32
    return %c0_i32, %c0_i32_0 : i32, i32
  }
  func.func @transform_9(%arg0: i32) -> (i32, i32) {
    %c0_i32 = arith.constant 0 : i32
    %c0_i32_0 = arith.constant 0 : i32
    return %arg0, %c0_i32 : i32, i32
  }
}

</mosaic_0001>

<bundles_post_ra>
// kernel: tpu_custom_call.1
= control target key start
LH: loop header
LB: loop body
LE: loop exit
PB: predicated region body
PF: predicated region fallthrough
CT: control target
= control target key end

     0   :  { %14 = vsyncpa [#allocation3], 0  ;;  %s1103_s0 = inlined_call_operand.vmem [shape: f32[8,128], index: 0, kind: input, shape index: {}]   ;;  %s1104_s1 = inlined_call_operand.vmem [shape: bf16[16,128], index: 1, kind: input, shape index: {}]   ;;  %s1105_s2 = inlined_call_operand.vmem [shape: f32[1,128], index: 2, kind: input, shape index: {}]   ;;  %s1106_s3 = inlined_call_operand.vmem [shape: bf16[128,128], index: 3, kind: input, shape index: {}]   ;;  %s1107_s4 = inlined_call_operand.vmem [shape: f32[1,128], index: 4, kind: input, shape index: {}]   ;;  %s1108_s5 = inlined_call_operand.hbm [shape: bf16[128,128], index: 5, kind: input, shape index: {}]   ;;  %s1109_s6 = inlined_call_operand.vmem [shape: f32[1,128], index: 6, kind: input, shape index: {}]   ;;  %s1110_s7 = inlined_call_operand.vmem [shape: bf16[128,16], index: 7, kind: input, shape index: {}]   ;;  %s1111_s8 = inlined_call_operand.vmem [shape: f32[1,16], index: 8, kind: input, shape index: {}]   ;;  %s1112_s9 = inlined_call_operand.hbm [shape: f32[8,128], index: 9, kind: output, shape index: {}]  }
   0x1   :  { %15 = vsyncpa [#allocation4], 0  ;;  %s932_s30 = smov [#allocation2]   ;;  %s884_s13 = scalar_lea.hbm %s1108_s5, 1024 }
   0x2   :  { %s31_s10 = sshll.u32 %s932_s30, 4  ;;  %p885_p0 = scmp.ne.s32.totalorder %s1108_s5, %s884_s13  ;;  %s32_s10 = int_to_ptr.vmem [resolvable:$true] %s31_s10 }
   0x3   :  { %p888_p1 = scmp.lt.u32.totalorder %s884_s13, %s1108_s5 }
   0x5   :  { %p890_p2 = pnand %p888_p1, %p885_p0 }
   0x7   :  { %893 = shalt.err (!%p890_p2)
}
   0x8   :  { %s894_s18 = scalar_lea.vmem %s32_s10, 1024  ;;  %p899_p4 = scmp.lt.s32.totalorder %s32_s10, %s32_s10 }
   0x9   :  { %p895_p3 = scmp.ne.s32.totalorder %s32_s10, %s894_s18  ;;  %p900_p5 = scmp.lt.s32.totalorder %s894_s18, %s894_s18 }
   0xb   :  { %p901_p6 = por %p900_p5, %p899_p4 }
   0xd   :  { %p902_p7 = pnand %p901_p6, %p895_p3 }
   0xf   :  { %905 = shalt.err (!%p902_p7)
}
  0x10   :  { %s933_s19 = smov 64   ;;  %s934_s20 = smov 4  }
  0x11   :  { %37 = dma.hbm_to_vmem [thread:$0]  %s1108_s5, 1024, %s32_s10, [#allocation3], %s933_s19, %s933_s19, %s934_s20  }
  0x12   :  { %928 = dma.done.wait [#allocation3], 1024  }
  0x13   :  { %929 = vsyncadd [#allocation3], 4294966272  ;;  %v48_v0 = vld [vmem:[%s1103_s0] sm:$0xff]  ;;  %s935_s25 = smov 112   ;;  %s936_s26 = smov 80   ;;  %v861_v3 = vld [vmem:[%s1106_s3 + $0x8] sm:$0xff]  }
  0x14   :  { %50 = vrot.lane.b32.xlu0 %v48_v0, %s935_s25  ;;  %56 = vrot.lane.b32.xlu1 %v48_v0, %s936_s26  ;;  %v859_v1 = vld [vmem:[%s1104_s1] sm:$0xff]   ;;  %s937_s0 = smov 96   ;;  %v862_v4 = vld [vmem:[%s1106_s3 + $0x10] sm:$0xff]   ;;  %s938_s12 = smov 48   ;;  %vm90_vm0 = vcmask 130048   ;;  %v869_v22 = vld [vmem:[#allocation2 + $0x8] sm:$0xff]  }
  0x15   :  { %v860_v2 = vld [vmem:[%s1106_s3] sm:$0xff]   ;;  %751 = vmatprep.subr.bf16.mxu0 %v859_v1  ;;  %s939_s13 = smov 32   ;;  %v863_v5 = vld [vmem:[%s1106_s3 + $0x18] sm:$0xff]   ;;  %s940_s16 = smov 16   ;;  %v865_v7 = vld [vmem:[%s1106_s3 + $0x28] sm:$0xff]   ;;  %vm649_vm1 = vcmask 261120  }
  0x16   :  { %752 = vmatpush3.bf16.msra.mxu0 %v859_v1  ;;  %761 = vmatprep.subr.bf16.mxu1 %v860_v2  ;;  %v864_v6 = vld [vmem:[%s1106_s3 + $0x20] sm:$0xff]   ;;  %v866_v19 = vld [vmem:[%s1106_s3 + $0x30] sm:$0xff]   ;;  %v867_v20 = vld [vmem:[%s1106_s3 + $0x38] sm:$0xff]   ;;  %vm651_vm2 = vcmask 392192   ;;  %vm653_vm3 = vcmask 523264   ;;  %vm655_vm4 = vcmask 654336  }
  0x17   :  { %762 = vmatpush3.bf16.msra.mxu1 %v860_v2  ;;  %v868_v21 = vld [vmem:[#allocation2] sm:$0xff]   ;;  %v870_v23 = vld [vmem:[#allocation2 + $0x10] sm:$0xff]   ;;  %v871_v24 = vld [vmem:[#allocation2 + $0x18] sm:$0xff]   ;;  %vm657_vm5 = vcmask 785408   ;;  %vm659_vm6 = vcmask 916480  }
  0x18   :  { %53 = vrot.lane.b32.xlu0 %v48_v0, %s937_s0  ;;  %59 = vrot.lane.b32.xlu1 %v48_v0, %s933_s19  ;;  %v872_v25 = vld [vmem:[#allocation2 + $0x20] sm:$0xff]   ;;  %v873_v26 = vld [vmem:[#allocation2 + $0x28] sm:$0xff]   ;;  %v874_v56 = vld [vmem:[#allocation2 + $0x30] sm:$0xff]  }
  0x19   :  { %763 = vmatprep.subr.bf16.mxu1 %v861_v3  ;;  %785 = vmatprep.subr.bf16.mxu0 %v868_v21  ;;  %v677_v27 = vld [vmem:[%s1105_s2] ss:$0 sm:$0xff]  ;;  %v875_v57 = vld [vmem:[#allocation2 + $0x38] sm:$0xff]   ;;  %v877_v59 = vld [vmem:[%s1110_s7 + $0x8] sm:$0xff]  }
  0x1a   :  { %v876_v58 = vld [vmem:[%s1110_s7] sm:$0xff]   ;;  %v878_v60 = vld [vmem:[%s1110_s7 + $0x10] sm:$0xff]   ;;  %v879_v61 = vld [vmem:[%s1110_s7 + $0x18] sm:$0xff]  }
  0x1b   :  { %764 = vmatpush3.bf16.msra.mxu1 %v861_v3  ;;  %v880_v62 = vld [vmem:[%s1110_s7 + $0x20] sm:$0xff]   ;;  %v881_v63 = vld [vmem:[%s1110_s7 + $0x28] sm:$0xff]  }
  0x1c   :  { %62 = vrot.lane.b32.xlu0 %v48_v0, %s938_s12  ;;  %65 = vrot.lane.b32.xlu1 %v48_v0, %s939_s13 }
  0x1d   :  { %765 = vmatprep.subr.bf16.mxu1 %v862_v4 }
  0x1f   :  { %766 = vmatpush3.bf16.msra.mxu1 %v862_v4 }
  0x20   :  { %68 = vrot.lane.b32.xlu0 %v48_v0, %s940_s16  ;;  %767 = vmatprep.subr.bf16.mxu1 %v863_v5 }
  0x23   :  { %768 = vmatpush3.bf16.msra.mxu1 %v863_v5 }
  0x24   :  { %769 = vmatprep.subr.bf16.mxu1 %v864_v6 }
  0x27   :  { %770 = vmatpush3.bf16.msra.mxu1 %v864_v6 }
  0x28   :  { %771 = vmatprep.subr.bf16.mxu1 %v865_v7 }
  0x2b   :  { %772 = vmatpush3.bf16.msra.mxu1 %v865_v7 }
  0x2c   :  { %773 = vmatprep.subr.bf16.mxu1 %v866_v19 }
  0x2f   :  { %774 = vmatpush3.bf16.msra.mxu1 %v866_v19 }
  0x30   :  { %775 = vmatprep.subr.bf16.mxu1 %v867_v20 }
  0x33   :  { %776 = vmatpush3.bf16.msra.mxu1 %v867_v20 }
  0x34   :  { %833 = vmatprep.subr.bf16.mxu1 %v876_v58 }
  0x86   :  { %v51_v8 = vpop.permute.xlu0 %50  ;;  %v57_v9 = vpop.permute.xlu1 %56 }
  0x87   :  { %v74_v10 = vpack.c.bf16 %v51_v8, %v48_v0  ;;  %v683_v0 = vld [vmem:[%s1107_s4] ss:$0 sm:$0xff] }
  0x89   :  { %753 = vmatprep.mubr.msk.bf16.mxu0 %vm90_vm0, %v74_v10 }
  0x8a   :  { %v54_v11 = vpop.permute.xlu0 %53  ;;  %v60_v12 = vpop.permute.xlu1 %59 }
  0x8b   :  { %v75_v13 = vpack.c.bf16 %v57_v9, %v54_v11 }
  0x8d   :  { %754 = vmatmul.mubr.msk.bf16.vlgmr.msra.gmra.mrb[0].mxu0 %vm90_vm0, %v75_v13 }
  0x8e   :  { %v63_v14 = vpop.permute.xlu0 %62  ;;  %v66_v16 = vpop.permute.xlu1 %65  ;;  %786 = vmatpush3.bf16.msra.mxu0 %v868_v21 }
  0x8f   :  { %v76_v15 = vpack.c.bf16 %v63_v14, %v60_v12  ;;  %787 = vmatprep.subr.bf16.mxu0 %v869_v22 }
  0x91   :  { %757 = vmatprep.mubr.msk.bf16.mxu0 %vm90_vm0, %v76_v15 }
  0x92   :  { %v69_v17 = vpop.permute.xlu0 %68  ;;  %788 = vmatpush3.bf16.msra.mxu0 %v869_v22 }
  0x93   :  { %v77_v18 = vpack.c.bf16 %v69_v17, %v66_v16  ;;  %789 = vmatprep.subr.bf16.mxu0 %v870_v23 }
  0x95   :  { %758 = vmatmul.mubr.msk.bf16.gmra.mrb[4].mxu0 %vm90_vm0, %v77_v18 }
  0x96   :  { %790 = vmatpush3.bf16.msra.mxu0 %v870_v23 }
  0x97   :  { %791 = vmatprep.subr.bf16.mxu0 %v871_v24 }
  0x9a   :  { %792 = vmatpush3.bf16.msra.mxu0 %v871_v24 }
  0x9b   :  { %793 = vmatprep.subr.bf16.mxu0 %v872_v25 }
  0x9e   :  { %794 = vmatpush3.bf16.msra.mxu0 %v872_v25 }
  0x9f   :  { %795 = vmatprep.subr.bf16.mxu0 %v873_v26 }
  0xa2   :  { %796 = vmatpush3.bf16.msra.mxu0 %v873_v26 }
  0xa3   :  { %797 = vmatprep.subr.bf16.mxu0 %v874_v56 }
  0xa6   :  { %798 = vmatpush3.bf16.msra.mxu0 %v874_v56 }
  0xa7   :  { %799 = vmatprep.subr.bf16.mxu0 %v875_v57 }
  0xaa   :  { %800 = vmatpush3.bf16.msra.mxu0 %v875_v57 }
  0xab   :  { %809 = vmatprep.subr.bf16.mxu0 %v876_v58 }
 0x160   :  { %v755_v28 = vpop.f32.mrb[0].mxu0 }
 0x161   :  { %v146_v29 = vadd.f32 %v755_v28, %v677_v27  ;;  %v137_v30 = vpop.f32.mrb[1].mxu0 }
 0x162   :  { %v138_v31 = vadd.f32 %v677_v27, %v137_v30  ;;  %v756_v32 = vpop.f32.mrb[2].mxu0  ;;  %v883_v30 = vld [vmem:[%s1110_s7 + $0x38] sm:$0xff]  }
 0x163   :  { %v149_v33 = vadd.f32 %v756_v32, %v677_v27  ;;  %v140_v34 = vpop.f32.mrb[3].mxu0  ;;  %v170_v36 = vmax.f32 %v146_v29, 0.0  ;;  %v882_v29 = vld [vmem:[%s1110_s7 + $0x30] sm:$0xff]  }
 0x164   :  { %v141_v35 = vadd.f32 %v677_v27, %v140_v34  ;;  %v168_v38 = vmax.f32 %v138_v31, 0.0  ;;  %v692_v31 = vld [vmem:[%s1109_s6] ss:$0 sm:$0xff] }
 0x165   :  { %v171_v37 = vmax.f32 %v149_v33, 0.0 }
 0x166   :  { %v169_v39 = vmax.f32 %v141_v35, 0.0 }
 0x167   :  { %v194_v40 = vpack.c.bf16 %v171_v37, %v170_v36 }
 0x168   :  { %v759_v41 = vpop.f32.mrb[4].mxu0  ;;  %v193_v42 = vpack.c.bf16 %v169_v39, %v168_v38 }
 0x169   :  { %v162_v43 = vadd.f32 %v759_v41, %v677_v27  ;;  %v153_v44 = vpop.f32.mrb[5].mxu0 }
 0x16a   :  { %v154_v45 = vadd.f32 %v677_v27, %v153_v44  ;;  %v760_v46 = vpop.f32.mrb[6].mxu0  ;;  %777 = vmatprep.mubr.bf16.mxu1 %v193_v42 }
 0x16b   :  { %v165_v47 = vadd.f32 %v760_v46, %v677_v27  ;;  %v156_v48 = vpop.f32.mrb[7].mxu0  ;;  %778 = vmatmul.mubr.bf16.vlgmr.msra.gmra.mrb[0].mxu1 %v194_v40  ;;  %v174_v50 = vmax.f32 %v162_v43, 0.0 }
 0x16c   :  { %v157_v49 = vadd.f32 %v677_v27, %v156_v48  ;;  %v172_v52 = vmax.f32 %v154_v45, 0.0  ;;  %841 = vmatpush3.bf16.msra.mxu1 %v876_v58 }
 0x16d   :  { %v175_v51 = vmax.f32 %v165_v47, 0.0  ;;  %834 = vmatprep.subr.bf16.mxu1 %v877_v59 }
 0x16e   :  { %v173_v53 = vmax.f32 %v157_v49, 0.0 }
 0x16f   :  { %v196_v54 = vpack.c.bf16 %v175_v51, %v174_v50 }
 0x170   :  { %v195_v55 = vpack.c.bf16 %v173_v53, %v172_v52  ;;  %842 = vmatpush3.bf16.msra.mxu1 %v877_v59 }
 0x171   :  { %835 = vmatprep.subr.bf16.mxu1 %v878_v60 }
 0x172   :  { %781 = vmatprep.mubr.bf16.mxu1 %v195_v55 }
 0x173   :  { %782 = vmatmul.mubr.bf16.gmra.mrb[4].mxu1 %v196_v54 }
 0x174   :  { %843 = vmatpush3.bf16.msra.mxu1 %v878_v60 }
 0x175   :  { %836 = vmatprep.subr.bf16.mxu1 %v879_v61 }
 0x178   :  { %844 = vmatpush3.bf16.msra.mxu1 %v879_v61 }
 0x179   :  { %837 = vmatprep.subr.bf16.mxu1 %v880_v62 }
 0x17c   :  { %845 = vmatpush3.bf16.msra.mxu1 %v880_v62 }
 0x17d   :  { %838 = vmatprep.subr.bf16.mxu1 %v881_v63 }
 0x180   :  { %846 = vmatpush3.bf16.msra.mxu1 %v881_v63 }
 0x181   :  { %839 = vmatprep.subr.bf16.mxu1 %v882_v29 }
 0x184   :  { %847 = vmatpush3.bf16.msra.mxu1 %v882_v29 }
 0x185   :  { %840 = vmatprep.subr.bf16.mxu1 %v883_v30 }
 0x188   :  { %848 = vmatpush3.bf16.msra.mxu1 %v883_v30 }
 0x23e   :  { %v779_v1 = vpop.f32.mrb[0].mxu1 }
 0x23f   :  { %v294_v2 = vadd.f32 %v779_v1, %v683_v0  ;;  %v285_v3 = vpop.f32.mrb[1].mxu1 }
 0x240   :  { %v286_v4 = vadd.f32 %v683_v0, %v285_v3  ;;  %v780_v5 = vpop.f32.mrb[2].mxu1 }
 0x241   :  { %v297_v6 = vadd.f32 %v780_v5, %v683_v0  ;;  %v288_v7 = vpop.f32.mrb[3].mxu1  ;;  %v318_v9 = vmax.f32 %v294_v2, 0.0 }
 0x242   :  { %v289_v8 = vadd.f32 %v683_v0, %v288_v7  ;;  %v316_v11 = vmax.f32 %v286_v4, 0.0 }
 0x243   :  { %v319_v10 = vmax.f32 %v297_v6, 0.0 }
 0x244   :  { %v317_v12 = vmax.f32 %v289_v8, 0.0 }
 0x245   :  { %v342_v13 = vpack.c.bf16 %v319_v10, %v318_v9 }
 0x246   :  { %v341_v14 = vpack.c.bf16 %v317_v12, %v316_v11  ;;  %v783_v15 = vpop.f32.mrb[4].mxu1 }
 0x247   :  { %v310_v16 = vadd.f32 %v783_v15, %v683_v0  ;;  %v301_v17 = vpop.f32.mrb[5].mxu1 }
 0x248   :  { %v302_v18 = vadd.f32 %v683_v0, %v301_v17  ;;  %v784_v19 = vpop.f32.mrb[6].mxu1  ;;  %801 = vmatprep.mubr.bf16.mxu0 %v341_v14 }
 0x249   :  { %v313_v20 = vadd.f32 %v784_v19, %v683_v0  ;;  %v304_v21 = vpop.f32.mrb[7].mxu1  ;;  %802 = vmatmul.mubr.bf16.vlgmr.msra.gmra.mrb[8].mxu0 %v342_v13  ;;  %v322_v23 = vmax.f32 %v310_v16, 0.0 }
 0x24a   :  { %v305_v22 = vadd.f32 %v683_v0, %v304_v21  ;;  %810 = vmatpush3.bf16.msra.mxu0 %v876_v58  ;;  %v320_v25 = vmax.f32 %v302_v18, 0.0 }
 0x24b   :  { %v323_v24 = vmax.f32 %v313_v20, 0.0  ;;  %811 = vmatprep.subr.bf16.mxu0 %v877_v59 }
 0x24c   :  { %v321_v26 = vmax.f32 %v305_v22, 0.0 }
 0x24d   :  { %v344_v27 = vpack.c.bf16 %v323_v24, %v322_v23 }
 0x24e   :  { %v343_v28 = vpack.c.bf16 %v321_v26, %v320_v25  ;;  %812 = vmatpush3.bf16.msra.mxu0 %v877_v59 }
 0x24f   :  { %813 = vmatprep.subr.bf16.mxu0 %v878_v60 }
 0x250   :  { %805 = vmatprep.mubr.bf16.mxu0 %v343_v28 }
 0x251   :  { %806 = vmatmul.mubr.bf16.gmra.mrb[12].mxu0 %v344_v27 }
 0x252   :  { %814 = vmatpush3.bf16.msra.mxu0 %v878_v60  ;;  %v701_v60 = vld [vmem:[%s1111_s8] ss:$0 sm:$0xff]  ;;  %s941_s8 = smov [#allocation5]  }
 0x253   :  { %815 = vmatprep.subr.bf16.mxu0 %v879_v61 }
 0x256   :  { %816 = vmatpush3.bf16.msra.mxu0 %v879_v61 }
 0x257   :  { %817 = vmatprep.subr.bf16.mxu0 %v880_v62 }
 0x25a   :  { %818 = vmatpush3.bf16.msra.mxu0 %v880_v62 }
 0x25b   :  { %819 = vmatprep.subr.bf16.mxu0 %v881_v63 }
 0x25e   :  { %820 = vmatpush3.bf16.msra.mxu0 %v881_v63 }
 0x25f   :  { %821 = vmatprep.subr.bf16.mxu0 %v882_v29 }
 0x262   :  { %822 = vmatpush3.bf16.msra.mxu0 %v882_v29 }
 0x263   :  { %823 = vmatprep.subr.bf16.mxu0 %v883_v30 }
 0x266   :  { %824 = vmatpush3.bf16.msra.mxu0 %v883_v30 }
 0x31c   :  { %v803_v32 = vpop.f32.mrb[8].mxu0 }
 0x31d   :  { %v442_v33 = vadd.f32 %v803_v32, %v692_v31  ;;  %v433_v34 = vpop.f32.mrb[9].mxu0 }
 0x31e   :  { %v434_v35 = vadd.f32 %v692_v31, %v433_v34  ;;  %v804_v36 = vpop.f32.mrb[10].mxu0 }
 0x31f   :  { %v445_v37 = vadd.f32 %v804_v36, %v692_v31  ;;  %v436_v38 = vpop.f32.mrb[11].mxu0  ;;  %v466_v40 = vmax.f32 %v442_v33, 0.0 }
 0x320   :  { %v437_v39 = vadd.f32 %v692_v31, %v436_v38  ;;  %v464_v42 = vmax.f32 %v434_v35, 0.0 }
 0x321   :  { %v467_v41 = vmax.f32 %v445_v37, 0.0 }
 0x322   :  { %v465_v43 = vmax.f32 %v437_v39, 0.0 }
 0x323   :  { %v490_v44 = vpack.c.bf16 %v467_v41, %v466_v40 }
 0x324   :  { %v489_v45 = vpack.c.bf16 %v465_v43, %v464_v42  ;;  %v807_v46 = vpop.f32.mrb[12].mxu0 }
 0x325   :  { %v458_v47 = vadd.f32 %v807_v46, %v692_v31  ;;  %v449_v48 = vpop.f32.mrb[13].mxu0 }
 0x326   :  { %v450_v49 = vadd.f32 %v692_v31, %v449_v48  ;;  %v808_v50 = vpop.f32.mrb[14].mxu0  ;;  %825 = vmatprep.mubr.bf16.mxu0 %v489_v45 }
 0x327   :  { %v461_v51 = vadd.f32 %v808_v50, %v692_v31  ;;  %v452_v52 = vpop.f32.mrb[15].mxu0  ;;  %826 = vmatmul.mubr.bf16.vlgmr.msra.gmra.mrb[16].mxu0 %v490_v44  ;;  %v470_v54 = vmax.f32 %v458_v47, 0.0 }
 0x328   :  { %v453_v53 = vadd.f32 %v692_v31, %v452_v52  ;;  %v468_v56 = vmax.f32 %v450_v49, 0.0 }
 0x329   :  { %v471_v55 = vmax.f32 %v461_v51, 0.0 }
 0x32a   :  { %v469_v57 = vmax.f32 %v453_v53, 0.0 }
 0x32b   :  { %v492_v58 = vpack.c.bf16 %v471_v55, %v470_v54 }
 0x32c   :  { %v491_v59 = vpack.c.bf16 %v469_v57, %v468_v56 }
 0x32e   :  { %829 = vmatprep.mubr.bf16.mxu1 %v491_v59 }
 0x32f   :  { %830 = vmatmul.mubr.bf16.vlgmr.msra.gmra.mrb[8].mxu1 %v492_v58 }
 0x3fa   :  { %v827_v61 = vpop.f32.mrb[16].mxu0 }
 0x3fb   :  { %v590_v62 = vadd.f32 %v827_v61, %v701_v60  ;;  %v581_v63 = vpop.f32.mrb[17].mxu0 }
 0x3fc   :  { %v582_v0 = vadd.f32 %v701_v60, %v581_v63  ;;  %v828_v1 = vpop.f32.mrb[18].mxu0 }
 0x3fd   :  { %v614_v2 = vmax.f32 %v590_v62, 0.0  ;;  %v593_v3 = vadd.f32 %v828_v1, %v701_v60  ;;  %v584_v4 = vpop.f32.mrb[19].mxu0 }
 0x3fe   :  { %v585_v6 = vadd.f32 %v701_v60, %v584_v4  ;;  %v612_v21 = vmax.f32 %v582_v0, 0.0 }
 0x3ff   :  { %v615_v5 = vmax.f32 %v593_v3, 0.0  ;;  %625 = vrot.lane.b32.xlu0 %v614_v2, %s939_s13 }
 0x400   :  { %v613_v8 = vmax.f32 %v585_v6, 0.0 }
 0x401   :  { %629 = vrot.lane.b32.xlu1 %v615_v5, %s938_s12 }
 0x402   :  { %v831_v7 = vpop.f32.mrb[8].mxu1 }
 0x403   :  { %v597_v9 = vpop.f32.mrb[9].mxu1  ;;  %v606_v13 = vadd.f32 %v831_v7, %v701_v60 }
 0x404   :  { %v598_v10 = vadd.f32 %v701_v60, %v597_v9  ;;  %v832_v11 = vpop.f32.mrb[10].mxu1 }
 0x405   :  { %621 = vrot.lane.b32.xlu1 %v613_v8, %s940_s16  ;;  %v600_v12 = vpop.f32.mrb[11].mxu1  ;;  %v609_v16 = vadd.f32 %v832_v11, %v701_v60  ;;  %v618_v18 = vmax.f32 %v606_v13, 0.0 }
 0x406   :  { %v616_v14 = vmax.f32 %v598_v10, 0.0  ;;  %v601_v15 = vadd.f32 %v701_v60, %v600_v12 }
 0x407   :  { %v619_v19 = vmax.f32 %v609_v16, 0.0 }
 0x408   :  { %v617_v17 = vmax.f32 %v601_v15, 0.0  ;;  %633 = vrot.lane.b32.xlu0 %v616_v14, %s933_s19  ;;  %s668_s19 = sshll.u32 %s941_s8, 4  ;;  %s669_s19 = int_to_ptr.vmem [resolvable:$true] %s668_s19 }
 0x409   :  { %p911_p9 = scmp.lt.s32.totalorder %s669_s19, %s669_s19 }
 0x40a   :  { %637 = vrot.lane.b32.xlu1 %v617_v17, %s936_s26 }
 0x40c   :  { %641 = vrot.lane.b32.xlu0 %v618_v18, %s937_s0 }
 0x40e   :  { %645 = vrot.lane.b32.xlu1 %v619_v19, %s935_s25  ;;  %s906_s25 = scalar_lea.vmem %s669_s19, 128 }
 0x40f   :  { %p907_p8 = scmp.ne.s32.totalorder %s669_s19, %s906_s25  ;;  %p912_p10 = scmp.lt.s32.totalorder %s906_s25, %s906_s25 }
 0x411   :  { %p913_p11 = por %p912_p10, %p911_p9 }
 0x413   :  { %p914_p12 = pnand %p913_p11, %p907_p8 }
 0x471   :  { %v626_v22 = vpop.permute.xlu0 %625 }
 0x473   :  { %v630_v20 = vpop.permute.xlu1 %629 }
 0x477   :  { %v622_v23 = vpop.permute.xlu1 %621 }
 0x478   :  { %v648_v24 = vsel %vm90_vm0, %v612_v21, %v622_v23 }
 0x479   :  { %v650_v25 = vsel %vm649_vm1, %v648_v24, %v626_v22 }
 0x47a   :  { %v652_v26 = vsel %vm651_vm2, %v650_v25, %v630_v20  ;;  %v634_v27 = vpop.permute.xlu0 %633 }
 0x47b   :  { %v654_v28 = vsel %vm653_vm3, %v652_v26, %v634_v27 }
 0x47c   :  { %v638_v29 = vpop.permute.xlu1 %637 }
 0x47d   :  { %v656_v30 = vsel %vm655_vm4, %v654_v28, %v638_v29 }
 0x47e   :  { %v642_v31 = vpop.permute.xlu0 %641 }
 0x47f   :  { %v658_v32 = vsel %vm657_vm5, %v656_v30, %v642_v31 }
 0x480   :  { %v646_v33 = vpop.permute.xlu1 %645 }
 0x481   :  { %v660_v34 = vsel %vm659_vm6, %v658_v32, %v646_v33 }
 0x482   :  { %661 = vst [vmem:[#allocation5] sm:$0xff] %v660_v34 }
 0x483   :  { %917 = shalt.err (!%p914_p12)
}
 0x484   :  { %s918_s12 = scalar_lea.hbm %s1112_s9, 128 }
 0x485   :  { %p919_p13 = scmp.ne.s32.totalorder %s1112_s9, %s918_s12  ;;  %p922_p0 = scmp.lt.u32.totalorder %s918_s12, %s1112_s9 }
 0x487   :  { %p924_p1 = pnand %p922_p0, %p919_p13 }
 0x489   :  { %927 = shalt.err (!%p924_p1)
}
 0x48a   :  { %671 = dma.vmem_to_hbm [thread:$0]  %s669_s19, 128, %s1112_s9, [#allocation4]  }
 0x48b   :  { %930 = dma.done.wait [#allocation4], 128  }
 0x48c   :  { %931 = vsyncadd [#allocation4], 4294967168 }
 0x48d   :  { %675 = vsyncpa [#allocation3], 1 }
 0x48e   :  { %676 = vsyncpa [#allocation4], 1 }

</bundles_post_ra>
